<compile_context>
chip_gen: v7x
topology: tpu7x:2x2x1
jax: 0.10.0
libtpu: 0.0.40
codegen_flags: <defaults>
</compile_context>

<pallas_src>
import math

import jax
import jax.numpy as jnp
from jax import lax
from jax.experimental import pallas as pl
from jax.experimental.pallas import tpu as pltpu

_LANE = 128
_SUBLANE = 8


def _round_up(x: int, m: int) -> int:
    return ((x + m - 1) // m) * m


def _make_sinusoidal_table(T: int, dim_model: int) -> jnp.ndarray:
    """Replicates TimeEmbedding.make_emb: interleaved [sin, cos] pairs."""
    half_freqs = jnp.exp(
        -(jnp.arange(0, dim_model, 2, dtype=jnp.float32) / dim_model)
        * math.log(10000.0)
    )                                                     # (dim_model//2,)
    pos = jnp.arange(T, dtype=jnp.float32)                # (T,)
    ang = pos[:, None] * half_freqs[None, :]              # (T, dim_model//2)
    emb = jnp.stack([jnp.sin(ang), jnp.cos(ang)], axis=-1)  # (T, dm//2, 2)
    return emb.reshape(T, dim_model)                      # matches .view()


def _xavier_uniform(key, fan_in: int, fan_out: int) -> jnp.ndarray:
    bound = math.sqrt(6.0 / (fan_in + fan_out))
    # Stored as (fan_in, fan_out): transpose of PyTorch's (out, in) layout, so
    # x @ W + b == x @ W_pt.T + b_pt.
    return jax.random.uniform(key, (fan_in, fan_out), jnp.float32, -bound, bound)


def make_time_embedding_params(key, T: int, dim_model: int, dim: int):
    """Raw parameters, matching TimeEmbedding.__init__ / initialize()."""
    assert dim_model % 2 == 0, "dimension of model should be even"
    k1, k2 = jax.random.split(key)
    return {
        "emb_table": _make_sinusoidal_table(T, dim_model),  # (T, dim_model)
        "w1": _xavier_uniform(k1, dim_model, dim),           # (dim_model, dim)
        "b1": jnp.zeros((dim,), jnp.float32),
        "w2": _xavier_uniform(k2, dim, dim),                  # (dim, dim)
        "b2": jnp.zeros((dim,), jnp.float32),
    }


def fuse_time_embedding_params(params):
    """Init-time fusion + lane-dense padding of the kernel operands.

    Returns:
      h1t:  (dim, T)      fused Embedding->Linear1 table, transposed so the
                          in-kernel gather reduces over the lane (last) axis.
      w2:   (dim, dim_p)  Linear2 weight, output width zero-padded to 128 lanes.
      b2:   (1, dim_p)    Linear2 bias, padded likewise.
    """
    h1 = params["emb_table"] @ params["w1"] + params["b1"][None, :]   # (T, dim)
    dim = params["w2"].shape[1]
    dim_p = _round_up(dim, _LANE)
    w2_p = jnp.zeros((dim, dim_p), jnp.float32).at[:, :dim].set(params["w2"])
    b2_p = jnp.zeros((1, dim_p), jnp.float32).at[0, :dim].set(params["b2"])
    return {"h1t": jnp.transpose(h1), "w2": w2_p, "b2": b2_p, "dim": dim}


def _time_embedding_kernel(t_ref, h1t_ref, w2_ref, b2_ref, out_ref):
    """Vectorized gather of fused H1 rows -> Swish -> Linear2, all in VMEM/vregs."""
    Bp = t_ref.shape[0]
    dim, T = h1t_ref.shape

    # One-hot timestep mask, (Bp, T): pure VPU work, no scalar dependency chain.
    onehot = (
        lax.broadcasted_iota(jnp.int32, (Bp, T), 1) == t_ref[...]
    ).astype(jnp.float32)

    # Exact vectorized gather (replaces the old serial per-row fori_loop and the
    # VMEM scratch): select rows of H1^T and reduce over the lane axis.
    sel = onehot[:, None, :] * h1t_ref[...][None, :, :]    # (Bp, dim, T)
    h = jnp.sum(sel, axis=-1)                              # (Bp, dim) == H1[t]

    # Swish: x * sigmoid(x)  (EUP exp, free slot).
    h = h * jax.nn.sigmoid(h)

    # Linear 2; output width pre-padded to a multiple of 128 -> full-width store.
    out = jnp.dot(h, w2_ref[...], preferred_element_type=jnp.float32) + b2_ref[...]
    out_ref[...] = out.astype(out_ref.dtype)


def time_embedding_forward(t, fused):
    h1t, w2, b2, dim = fused["h1t"], fused["w2"], fused["b2"], fused["dim"]
    T = h1t.shape[1]
    dim_p = w2.shape[1]

    B = t.shape[0]
    Bp = _round_up(max(B, 1), _SUBLANE)

    # Clamp indices (VMEM has no runtime OOB check) and pad the batch to a
    # sublane multiple; padded rows use index 0 and are sliced away below.
    t_i = jnp.clip(t.astype(jnp.int32), 0, T - 1)
    t_col = jnp.zeros((Bp, 1), jnp.int32).at[:B, 0].set(t_i)

    out = pl.pallas_call(
        _time_embedding_kernel,
        out_shape=jax.ShapeDtypeStruct((Bp, dim_p), jnp.float32),
        in_specs=[
            pl.BlockSpec(memory_space=pltpu.MemorySpace.VMEM),  # t   (Bp, 1)
            pl.BlockSpec(memory_space=pltpu.MemorySpace.VMEM),  # H1^T (dim, T)
            pl.BlockSpec(memory_space=pltpu.MemorySpace.VMEM),  # W2  (dim, dim_p)
            pl.BlockSpec(memory_space=pltpu.MemorySpace.VMEM),  # b2  (1, dim_p)
        ],
        out_specs=pl.BlockSpec(memory_space=pltpu.MemorySpace.VMEM),
    )(t_col, h1t, w2, b2)

    return out[:B, :dim]


if __name__ == "__main__":
    # Small shapes consistent with the module: T timesteps, even dim_model, dim.
    T = 16          # number of timesteps (embedding table rows)
    dim_model = 32  # sinusoidal embedding width (must be even)
    dim = 64        # hidden / output width
    B = 8           # batch of timestep indices

    key = jax.random.PRNGKey(0)
    k_t, k_p = jax.random.split(key)

    params = make_time_embedding_params(k_p, T, dim_model, dim)
    fused = fuse_time_embedding_params(params)

    t = jax.random.randint(k_t, (B,), 0, T, dtype=jnp.int32)

    out = time_embedding_forward(t, fused)
    out = jax.block_until_ready(out)

    # Pure-JAX reference following the original module order:
    # Embedding -> Linear1 -> Swish -> Linear2.
    x_ref = params["emb_table"][t]
    h_ref = x_ref @ params["w1"] + params["b1"][None, :]
    h_ref = h_ref * jax.nn.sigmoid(h_ref)
    ref = h_ref @ params["w2"] + params["b2"][None, :]

    assert out.shape == (B, dim)
    assert jnp.allclose(out, ref, atol=1e-4, rtol=1e-4)
    print("KERNEL_OK")
</pallas_src>

<mosaic_0001>
module attributes {stable_mosaic.version = 11 : i64} {
  func.func @_time_embedding_kernel(%arg0: memref<8x1xi32, #tpu.memory_space<vmem>>, %arg1: memref<64x16xf32, #tpu.memory_space<vmem>>, %arg2: memref<64x128xf32, #tpu.memory_space<vmem>>, %arg3: memref<1x128xf32, #tpu.memory_space<vmem>>, %arg4: memref<8x128xf32, #tpu.memory_space<vmem>>) attributes {dimension_semantics = [], scalar_prefetch = 0 : i64, scratch_operands = 0 : i64, tpu.core_type = #tpu.core_type<tc>} {
    %0 = tpu.iota {dimensions = array<i32: 1>} : vector<8x16xi32>
    %c0 = arith.constant 0 : index
    %c0_0 = arith.constant 0 : index
    %1 = vector.load %arg0[%c0, %c0_0] : memref<8x1xi32, #tpu.memory_space<vmem>>, vector<8x1xi32>
    %2 = vector.broadcast %1 : vector<8x1xi32> to vector<8x16xi32>
    %3 = arith.cmpi eq, %0, %2 : vector<8x16xi32>
    %4 = arith.extui %3 : vector<8x16xi1> to vector<8x16xi32>
    %5 = arith.sitofp %4 : vector<8x16xi32> to vector<8x16xf32>
    %6 = vector.shape_cast %5 : vector<8x16xf32> to vector<8x1x16xf32>
    %c0_1 = arith.constant 0 : index
    %c0_2 = arith.constant 0 : index
    %7 = vector.load %arg1[%c0_1, %c0_2] : memref<64x16xf32, #tpu.memory_space<vmem>>, vector<64x16xf32>
    %8 = vector.shape_cast %7 : vector<64x16xf32> to vector<1x64x16xf32>
    %9 = vector.broadcast %6 : vector<8x1x16xf32> to vector<8x64x16xf32>
    %10 = vector.broadcast %8 : vector<1x64x16xf32> to vector<8x64x16xf32>
    %11 = arith.mulf %9, %10 : vector<8x64x16xf32>
    %cst = arith.constant dense<0.000000e+00> : vector<8x64xf32>
    %12 = vector.multi_reduction <add>, %11, %cst [2] : vector<8x64x16xf32> to vector<8x64xf32>
    %13 = arith.negf %12 : vector<8x64xf32>
    %14 = math.exp %13 : vector<8x64xf32>
    %cst_3 = arith.constant 1.000000e+00 : f32
    %15 = vector.broadcast %cst_3 : f32 to vector<8x64xf32>
    %16 = arith.addf %15, %14 : vector<8x64xf32>
    %17 = arith.divf %15, %16 : vector<8x64xf32>
    %18 = arith.mulf %12, %17 : vector<8x64xf32>
    %c0_4 = arith.constant 0 : index
    %c0_5 = arith.constant 0 : index
    %19 = vector.load %arg2[%c0_4, %c0_5] : memref<64x128xf32, #tpu.memory_space<vmem>>, vector<64x128xf32>
    %cst_6 = arith.constant dense<0.000000e+00> : vector<8x128xf32>
    %20 = tpu.matmul %18, %19, %cst_6 {dimension_numbers = #tpu.dot_dimension_numbers<[1], [0], [0], [1], [0, 0, 1, 1], [], []>} : vector<8x64xf32>, vector<64x128xf32>, vector<8x128xf32> -> vector<8x128xf32>
    %c0_7 = arith.constant 0 : index
    %c0_8 = arith.constant 0 : index
    %21 = vector.load %arg3[%c0_7, %c0_8] : memref<1x128xf32, #tpu.memory_space<vmem>>, vector<1x128xf32>
    %22 = vector.broadcast %21 : vector<1x128xf32> to vector<8x128xf32>
    %23 = arith.addf %20, %22 : vector<8x128xf32>
    %c0_9 = arith.constant 0 : index
    %c0_10 = arith.constant 0 : index
    %24 = vector.load %arg4[%c0_9, %c0_10] : memref<8x128xf32, #tpu.memory_space<vmem>>, vector<8x128xf32>
    tpu.vector_store %arg4[%c0_9, %c0_10], %23 {strides = array<i32>} : memref<8x128xf32, #tpu.memory_space<vmem>>, vector<8x128xf32>,
    return
  }
}

</mosaic_0001>

<bundles_post_ra>
// kernel: tpu_custom_call.1
= control target key start
LH: loop header
LB: loop body
LE: loop exit
PB: predicated region body
PF: predicated region fallthrough
CT: control target
= control target key end

     0   :  { %v1731_v1 = vmov 0   ;;  %s2579_s0 = inlined_call_operand.vmem [shape: s32[8,1], index: 0, kind: input, shape index: {}]   ;;  %s2580_s1 = inlined_call_operand.vmem [shape: f32[64,16], index: 1, kind: input, shape index: {}]   ;;  %s2581_s2 = inlined_call_operand.vmem [shape: f32[64,128], index: 2, kind: input, shape index: {}]   ;;  %s2582_s3 = inlined_call_operand.vmem [shape: f32[1,128], index: 3, kind: input, shape index: {}]   ;;  %s2583_s4 = inlined_call_operand.hbm [shape: f32[8,128], index: 4, kind: output, shape index: {}]  }
   0x1   :  { %v20_v0 = vld [vmem:[%s2579_s0] sm:$0xff]  ;;  %1450 = vset.pattern.permute.xlu0 %v1731_v1 }
   0x2   :  { %9 = vsyncpa [#allocation3], 0  ;;  %22 = vperm.xlu0 %1450, %v20_v0   ;;  %v1732_v2 = vmov 1966171168   ;;  %v18_v4 = vlaneseq  ;;  %v1733_v10 = vmov 0.0   ;;  %v1776_v18 = vld [vmem:[%s2580_s1 + $0x8] sm:$0xff] }
   0x3   :  { %v30_v3 = vunpack.c.l.s4 %v1732_v2  ;;  %v1781_v19 = vld [vmem:[%s2580_s1] sm:$0xff]  ;;  %vm189_vm1 = vcmask 130048   ;;  %v1786_v22 = vld [vmem:[%s2580_s1 + $0x10] sm:$0xff]  ;;  %v1806_v35 = vld [vmem:[%s2580_s1 + $0x18] sm:$0xff]  ;;  %vm918_vm2 = vcmask 130112   ;;  %vm925_vm3 = vcmask 195712  }
   0x4   :  { %v1765_v6 = vshrl.u32 %v18_v4, 7  ;;  %v1767_v7 = vand.u32 127, %v18_v4  ;;  %v1791_v23 = vld [vmem:[%s2580_s1 + $0x30] sm:$0xff]  ;;  %v1811_v36 = vld [vmem:[%s2580_s1 + $0x38] sm:$0xff]  ;;  %v1822_v44 = vld [vmem:[%s2580_s1 + $0x20] sm:$0xff]  ;;  %vm932_vm4 = vcmask 261312  }
   0x5   :  { %v31_v5 = vunpack.c.0.s8 %v30_v3  ;;  %v1830_v48 = vld [vmem:[%s2580_s1 + $0x28] sm:$0xff]  ;;  %vm939_vm5 = vcmask 326912   ;;  %vm946_vm6 = vcmask 392512   ;;  %vm953_vm7 = vcmask 458112   ;;  %s1736_s21 = smov [#allocation2]  }
   0x6   :  { %v87_v14 = vsub.s32 0, %v1765_v6  ;;  %vm960_vm8 = vcmask 523712   ;;  %vm1735_vm9 = vmmov 0   ;;  %vm1235_vm10 = vcmask 1041409   ;;  %s1329_s22 = sshll.u32 %s1736_s21, 4  ;;  %s1330_s22 = int_to_ptr.vmem [resolvable:$true] %s1329_s22 }
   0x7   :  { %v34_v8 = vsub.s32 %v31_v5, %v1765_v6  ;;  %1429 = vmatprep.mubr.msk.f32.mxu0 %vm1735_vm9, %v1733_v10  ;;  %vm1237_vm11 = vcmask 1042434   ;;  %vm1239_vm12 = vcmask 1043459   ;;  %vm1241_vm13 = vcmask 1044484   ;;  %s1707_s23 = scalar_lea.vmem %s1330_s22, 128  ;;  %p1712_p1 = scmp.lt.s32.totalorder %s1330_s22, %s1330_s22 }
   0x8   :  { %vm1243_vm14 = vcmask 1045509   ;;  %vm1245_vm15 = vcmask 1046534   ;;  %p1708_p0 = scmp.ne.s32.totalorder %s1330_s22, %s1707_s23  ;;  %p1713_p2 = scmp.lt.s32.totalorder %s1707_s23, %s1707_s23 }
   0xa   :  { %p1714_p3 = por %p1713_p2, %p1712_p1 }
   0xc   :  { %p1715_p4 = pnand %p1714_p3, %p1708_p0 }
  0x81   :  { %v23_v9 = vpop.permute.xlu0 %22 }
  0x82   :  { %vm24_vm0 = vcmp.eq.s32.totalorder %v1767_v7, %v23_v9 }
  0x83   :  { %v1337_v11 = vsel %vm24_vm0, 1.0, %v1733_v10  ;;  %vm1247_vm0 = vcmask 1047559  }
  0x84   :  { %v28_v12 = vcombine.high %v1337_v11, %v1337_v11  ;;  %v35_v13 = vrot.slane %v1337_v11, %v34_v8 }
  0x86   :  { %v42_v15 = vrot.slane %v28_v12, %v34_v8  ;;  %v51_v16 = vrot.slane %v35_v13, %v34_v8  ;;  %v43_v26 = vcombine.high %v35_v13, %v35_v13 }
  0x88   :  { %v44_v17 = vcombine.high %v42_v15, %v42_v15  ;;  %v88_v20 = vrot.slane %v51_v16, %v87_v14  ;;  %v73_v27 = vcombine.high %v51_v16, %v51_v16  ;;  %v58_v37 = vrot.slane %v42_v15, %v34_v8 }
  0x89   :  { %v65_v38 = vrot.slane %v43_v26, %v34_v8 }
  0x8a   :  { %v72_v21 = vrot.slane %v44_v17, %v34_v8  ;;  %v126_v24 = vmul.f32 %v88_v20, %v1776_v18  ;;  %v125_v25 = vmul.f32 %v88_v20, %v1781_v19  ;;  %v127_v32 = vmul.f32 %v88_v20, %v1786_v22 }
  0x8b   :  { %v131_v33 = vmul.f32 %v88_v20, %v1791_v23  ;;  %v1813_v39 = vrot.slane %v73_v27, %v87_v14  ;;  %v128_v42 = vmul.f32 %v88_v20, %v1806_v35  ;;  %v132_v43 = vmul.f32 %v88_v20, %v1811_v36 }
  0x8c   :  { %v76_v28 = vcombine.high %v72_v21, %v72_v21  ;;  %v1795_v29 = vrot.slane %v72_v21, %v87_v14  ;;  %v193_v30 = vsel %vm189_vm1, %v126_v24, 0.0  ;;  %v190_v31 = vsel %vm189_vm1, %v125_v25, 0.0 }
  0x8d   :  { %194 = vadd.xlane.f32.xlu1 %v193_v30  ;;  %191 = vadd.xlane.f32.xlu0 %v190_v31  ;;  %v196_v40 = vsel %vm189_vm1, %v127_v32, 0.0  ;;  %v208_v41 = vsel %vm189_vm1, %v131_v33, 0.0  ;;  %v74_v45 = vcombine.high %v58_v37, %v58_v37  ;;  %v1824_v46 = vrot.slane %v65_v38, %v87_v14 }
  0x8e   :  { %v1801_v34 = vrot.slane %v76_v28, %v87_v14  ;;  %v129_v47 = vmul.f32 %v88_v20, %v1822_v44  ;;  %v1832_v49 = vrot.slane %v58_v37, %v87_v14  ;;  %v199_v50 = vsel %vm189_vm1, %v128_v42, 0.0 }
  0x8f   :  { %v211_v51 = vsel %vm189_vm1, %v132_v43, 0.0  ;;  %v143_v52 = vmul.f32 %v1813_v39, %v1786_v22  ;;  %v75_v53 = vcombine.high %v65_v38, %v65_v38  ;;  %v130_v54 = vmul.f32 %v88_v20, %v1830_v48 }
  0x90   :  { %v1839_v55 = vrot.slane %v74_v45, %v87_v14  ;;  %v202_v56 = vsel %vm189_vm1, %v129_v47, 0.0  ;;  %v137_v57 = vmul.f32 %v1824_v46, %v1822_v44  ;;  %v133_v58 = vmul.f32 %v1824_v46, %v1781_v19 }
  0x91   :  { %197 = vadd.xlane.f32.xlu1 %v196_v40  ;;  %209 = vadd.xlane.f32.xlu0 %v208_v41  ;;  %v244_v59 = vsel %vm189_vm1, %v143_v52, 0.0  ;;  %v158_v60 = vmul.f32 %v1832_v49, %v1776_v18  ;;  %v134_v61 = vmul.f32 %v1824_v46, %v1776_v18  ;;  %v138_v62 = vmul.f32 %v1824_v46, %v1830_v48 }
  0x92   :  { %v1853_v63 = vrot.slane %v75_v53, %v87_v14  ;;  %v205_v0 = vsel %vm189_vm1, %v130_v54, 0.0  ;;  %v135_v1 = vmul.f32 %v1824_v46, %v1786_v22  ;;  %v226_v2 = vsel %vm189_vm1, %v137_v57, 0.0 }
  0x93   :  { %v214_v3 = vsel %vm189_vm1, %v133_v58, 0.0  ;;  %v146_v4 = vmul.f32 %v1813_v39, %v1830_v48  ;;  %v165_v5 = vmul.f32 %v1795_v29, %v1781_v19  ;;  %v289_v8 = vsel %vm189_vm1, %v158_v60, 0.0 }
  0x94   :  { %v217_v9 = vsel %vm189_vm1, %v134_v61, 0.0  ;;  %v229_v11 = vsel %vm189_vm1, %v138_v62, 0.0  ;;  %v173_v12 = vmul.f32 %v1839_v55, %v1781_v19  ;;  %v1871_v13 = vmul.f32 %v1813_v39, %v1781_v19 }
  0x95   :  { %200 = vadd.xlane.f32.xlu1 %v199_v50  ;;  %212 = vadd.xlane.f32.xlu0 %v211_v51  ;;  %v1875_v14 = vmul.f32 %v1832_v49, %v1806_v35  ;;  %v1878_v15 = vsel %vm189_vm1, %v165_v5, 0.0  ;;  %v175_v16 = vmul.f32 %v1839_v55, %v1786_v22  ;;  %v220_v17 = vsel %vm189_vm1, %v135_v1, 0.0 }
  0x96   :  { %v1884_v20 = vsel %vm189_vm1, %v173_v12, 0.0  ;;  %v149_v21 = vmul.f32 %v1853_v63, %v1781_v19  ;;  %v155_v24 = vmul.f32 %v1853_v63, %v1791_v23  ;;  %v253_v25 = vsel %vm189_vm1, %v146_v4, 0.0 }
  0x97   :  { %v1892_v26 = vsel %vm189_vm1, %v175_v16, 0.0  ;;  %v166_v27 = vmul.f32 %v1795_v29, %v1776_v18  ;;  %v169_v28 = vmul.f32 %v1795_v29, %v1822_v44  ;;  %v153_v32 = vmul.f32 %v1853_v63, %v1822_v44 }
  0x98   :  { %v1899_v30 = vsel %vm189_vm1, %v149_v21, 0.0  ;;  %v1902_v31 = vsel %vm189_vm1, %v155_v24, 0.0  ;;  %v177_v33 = vmul.f32 %v1839_v55, %v1822_v44  ;;  %v167_v40 = vmul.f32 %v1795_v29, %v1786_v22 }
  0x99   :  { %203 = vadd.xlane.f32.xlu1 %v202_v56  ;;  %245 = vadd.xlane.f32.xlu0 %v244_v59  ;;  %v1909_v37 = vsel %vm189_vm1, %v166_v27, 0.0  ;;  %v1912_v38 = vsel %vm189_vm1, %v169_v28, 0.0  ;;  %v178_v41 = vmul.f32 %v1839_v55, %v1830_v48  ;;  %v1919_v42 = vsel %vm189_vm1, %v153_v32, 0.0 }
  0x9a   :  { %v1922_v43 = vsel %vm189_vm1, %v177_v33, 0.0  ;;  %v174_v45 = vmul.f32 %v1839_v55, %v1776_v18  ;;  %v172_v47 = vmul.f32 %v1795_v29, %v1811_v36  ;;  %v1929_v50 = vsel %vm189_vm1, %v167_v40, 0.0 }
  0x9b   :  { %v1932_v51 = vsel %vm189_vm1, %v178_v41, 0.0  ;;  %v154_v52 = vmul.f32 %v1853_v63, %v1830_v48  ;;  %v182_v53 = vmul.f32 %v1801_v34, %v1776_v18  ;;  %v168_v57 = vmul.f32 %v1795_v29, %v1806_v35 }
  0x9c   :  { %v1939_v54 = vsel %vm189_vm1, %v174_v45, 0.0  ;;  %v1942_v56 = vsel %vm189_vm1, %v172_v47, 0.0  ;;  %v183_v58 = vmul.f32 %v1801_v34, %v1786_v22  ;;  %v176_v61 = vmul.f32 %v1839_v55, %v1806_v35 }
  0x9d   :  { %206 = vadd.xlane.f32.xlu1 %v205_v0  ;;  %227 = vadd.xlane.f32.xlu0 %v226_v2  ;;  %v1949_v59 = vsel %vm189_vm1, %v154_v52, 0.0  ;;  %v1952_v60 = vsel %vm189_vm1, %v182_v53, 0.0  ;;  %v186_v62 = vmul.f32 %v1801_v34, %v1830_v48  ;;  %v1959_v0 = vsel %vm189_vm1, %v168_v57, 0.0 }
  0x9e   :  { %v1962_v1 = vsel %vm189_vm1, %v183_v58, 0.0  ;;  %v156_v2 = vmul.f32 %v1853_v63, %v1811_v36  ;;  %v1969_v4 = vsel %vm189_vm1, %v176_v61, 0.0  ;;  %v179_v16 = vmul.f32 %v1839_v55, %v1791_v23 }
  0x9f   :  { %v1972_v5 = vsel %vm189_vm1, %v186_v62, 0.0  ;;  %v180_v21 = vmul.f32 %v1839_v55, %v1811_v36  ;;  %v184_v28 = vmul.f32 %v1801_v34, %v1806_v35  ;;  %v185_v55 = vmul.f32 %v1801_v34, %v1822_v44 }
  0xa0   :  { %v1999_v32 = vsel %vm189_vm1, %v179_v16, 0.0  ;;  %v147_v40 = vmul.f32 %v1813_v39, %v1791_v23  ;;  %v238_v47 = vsel %vm189_vm1, %v1871_v13, 0.0  ;;  %v295_v52 = vsel %vm189_vm1, %v1875_v14, 0.0 }
  0xa1   :  { %215 = vadd.xlane.f32.xlu1 %v214_v3  ;;  %290 = vadd.xlane.f32.xlu0 %v289_v8  ;;  %v187_v3 = vmul.f32 %v1801_v34, %v1791_v23  ;;  %v170_v8 = vmul.f32 %v1795_v29, %v1830_v48  ;;  %v2002_v33 = vsel %vm189_vm1, %v180_v21, 0.0  ;;  %v2016_v45 = vsel %vm189_vm1, %v184_v28, 0.0 }
  0xa2   :  { %v256_v58 = vsel %vm189_vm1, %v147_v40, 0.0  ;;  %v136_v61 = vmul.f32 %v1824_v46, %v1806_v35  ;;  %v161_v13 = vmul.f32 %v1832_v49, %v1822_v44  ;;  %v164_v16 = vmul.f32 %v1832_v49, %v1811_v36 }
  0xa3   :  { %v1982_v12 = vsel %vm189_vm1, %v187_v3, 0.0  ;;  %v1989_v24 = vsel %vm189_vm1, %v170_v8, 0.0  ;;  %v163_v3 = vmul.f32 %v1832_v49, %v1791_v23  ;;  %v157_v21 = vmul.f32 %v1832_v49, %v1781_v19 }
  0xa4   :  { %v223_v14 = vsel %vm189_vm1, %v136_v61, 0.0  ;;  %v298_v62 = vsel %vm189_vm1, %v161_v13, 0.0 }
  0xa5   :  { %218 = vadd.xlane.f32.xlu1 %v217_v9  ;;  %230 = vadd.xlane.f32.xlu0 %v229_v11  ;;  %v171_v9 = vmul.f32 %v1795_v29, %v1791_v23  ;;  %v1979_v11 = vsel %vm189_vm1, %v156_v2, 0.0  ;;  %v181_v29 = vmul.f32 %v1801_v34, %v1781_v19  ;;  %v144_v2 = vmul.f32 %v1813_v39, %v1806_v35 }
  0xa6   :  { %v286_v28 = vsel %vm189_vm1, %v157_v21, 0.0  ;;  %v151_v19 = vmul.f32 %v1853_v63, %v1786_v22 }
  0xa7   :  { %v1992_v27 = vsel %vm189_vm1, %v171_v9, 0.0  ;;  %v2013_v41 = vsel %vm189_vm1, %v181_v29, 0.0  ;;  %v247_v8 = vsel %vm189_vm1, %v144_v2, 0.0  ;;  %v304_v9 = vsel %vm189_vm1, %v163_v3, 0.0 }
  0xa8   :  { %v307_v29 = vsel %vm189_vm1, %v164_v16, 0.0 }
  0xa9   :  { %221 = vadd.xlane.f32.xlu1 %v220_v17  ;;  %254 = vadd.xlane.f32.xlu0 %v253_v25  ;;  %v188_v17 = vmul.f32 %v1801_v34, %v1811_v36  ;;  %v142_v25 = vmul.f32 %v1813_v39, %v1776_v18  ;;  %v2023_v34 = vsel %vm189_vm1, %v185_v55, 0.0  ;;  %v150_v55 = vmul.f32 %v1853_v63, %v1776_v18 }
  0xab   :  { %v2026_v53 = vsel %vm189_vm1, %v188_v17, 0.0  ;;  %v241_v57 = vsel %vm189_vm1, %v142_v25, 0.0  ;;  %v145_v17 = vmul.f32 %v1813_v39, %v1822_v44  ;;  %v265_v25 = vsel %vm189_vm1, %v150_v55, 0.0 }
  0xac   :  { %v152_v44 = vmul.f32 %v1853_v63, %v1806_v35  ;;  %v162_v35 = vmul.f32 %v1832_v49, %v1830_v48 }
  0xad   :  { %239 = vadd.xlane.f32.xlu1 %v238_v47  ;;  %296 = vadd.xlane.f32.xlu0 %v295_v52  ;;  %v250_v40 = vsel %vm189_vm1, %v145_v17, 0.0  ;;  %v159_v47 = vmul.f32 %v1832_v49, %v1786_v22  ;;  %v268_v52 = vsel %vm189_vm1, %v151_v19, 0.0  ;;  %v140_v22 = vmul.f32 %v1824_v46, %v1811_v36 }
  0xaf   :  { %v292_v18 = vsel %vm189_vm1, %v159_v47, 0.0  ;;  %v235_v13 = vsel %vm189_vm1, %v140_v22, 0.0 }
  0xb1   :  { %242 = vadd.xlane.f32.xlu1 %v241_v57  ;;  %257 = vadd.xlane.f32.xlu0 %v256_v58  ;;  %v139_v57 = vmul.f32 %v1824_v46, %v1791_v23  ;;  %v271_v58 = vsel %vm189_vm1, %v152_v44, 0.0  ;;  %v301_v46 = vsel %vm189_vm1, %v162_v35, 0.0 }
  0xb3   :  { %v232_v61 = vsel %vm189_vm1, %v139_v57, 0.0 }
  0xb5   :  { %224 = vadd.xlane.f32.xlu1 %v223_v14  ;;  %299 = vadd.xlane.f32.xlu0 %v298_v62  ;;  %v148_v14 = vmul.f32 %v1813_v39, %v1811_v36 }
  0xb7   :  { %v259_v23 = vsel %vm189_vm1, %v148_v14, 0.0  ;;  %vm1249_vm1 = vcmask 523264  }
  0xb9   :  { %248 = vadd.xlane.f32.xlu1 %v247_v8  ;;  %305 = vadd.xlane.f32.xlu0 %v304_v9  ;;  %v920_v9 = vadd.s32 4294967280, %v1767_v7 }
  0xbd   :  { %308 = vadd.xlane.f32.xlu0 %v307_v29  ;;  %287 = vadd.xlane.f32.xlu1 %v286_v28  ;;  %v2148_v28 = vsub.s32 %v1767_v7, %v1765_v6 }
  0xc1   :  { %266 = vadd.xlane.f32.xlu0 %v265_v25  ;;  %251 = vadd.xlane.f32.xlu1 %v250_v40 }
  0xc5   :  { %269 = vadd.xlane.f32.xlu0 %v268_v52  ;;  %293 = vadd.xlane.f32.xlu1 %v292_v18  ;;  %v927_v52 = vadd.s32 4294967272, %v1767_v7 }
  0xc9   :  { %272 = vadd.xlane.f32.xlu0 %v271_v58  ;;  %233 = vadd.xlane.f32.xlu1 %v232_v61  ;;  %v2159_v61 = vsub.s32 %v920_v9, %v1765_v6 }
  0xcd   :  { %236 = vadd.xlane.f32.xlu1 %v235_v13  ;;  %311 = vadd.xlane.f32.xlu0 %v1878_v15 }
  0xd1   :  { %260 = vadd.xlane.f32.xlu1 %v259_v23  ;;  %335 = vadd.xlane.f32.xlu0 %v1884_v20 }
  0xd5   :  { %302 = vadd.xlane.f32.xlu1 %v301_v46  ;;  %341 = vadd.xlane.f32.xlu0 %v1892_v26 }
  0xd9   :  { %263 = vadd.xlane.f32.xlu1 %v1899_v30  ;;  %281 = vadd.xlane.f32.xlu0 %v1902_v31 }
  0xdd   :  { %314 = vadd.xlane.f32.xlu1 %v1909_v37  ;;  %323 = vadd.xlane.f32.xlu0 %v1912_v38 }
  0xe1   :  { %275 = vadd.xlane.f32.xlu1 %v1919_v42  ;;  %347 = vadd.xlane.f32.xlu0 %v1922_v43 }
  0xe5   :  { %317 = vadd.xlane.f32.xlu1 %v1929_v50  ;;  %350 = vadd.xlane.f32.xlu0 %v1932_v51 }
  0xe9   :  { %338 = vadd.xlane.f32.xlu1 %v1939_v54  ;;  %332 = vadd.xlane.f32.xlu0 %v1942_v56 }
  0xed   :  { %278 = vadd.xlane.f32.xlu1 %v1949_v59  ;;  %362 = vadd.xlane.f32.xlu0 %v1952_v60 }
  0xf1   :  { %320 = vadd.xlane.f32.xlu1 %v1959_v0  ;;  %365 = vadd.xlane.f32.xlu0 %v1962_v1 }
  0xf5   :  { %344 = vadd.xlane.f32.xlu1 %v1969_v4  ;;  %374 = vadd.xlane.f32.xlu0 %v1972_v5 }
  0xf9   :  { %284 = vadd.xlane.f32.xlu1 %v1979_v11  ;;  %377 = vadd.xlane.f32.xlu0 %v1982_v12  ;;  %v913_v11 = vadd.s32 4294967288, %v1767_v7 }
  0xfb   :  { %v2138_v62 = vsub.s32 %v913_v11, %v1765_v6 }
  0xfd   :  { %326 = vadd.xlane.f32.xlu1 %v1989_v24 }
 0x101   :  { %329 = vadd.xlane.f32.xlu1 %v1992_v27 }
 0x105   :  { %353 = vadd.xlane.f32.xlu1 %v1999_v32 }
 0x109   :  { %356 = vadd.xlane.f32.xlu1 %v2002_v33 }
 0x10d   :  { %359 = vadd.xlane.f32.xlu1 %v2013_v41 }
 0x111   :  { %368 = vadd.xlane.f32.xlu1 %v2016_v45 }
 0x115   :  { %371 = vadd.xlane.f32.xlu1 %v2023_v34 }
 0x119   :  { %380 = vadd.xlane.f32.xlu1 %v2026_v53 }
 0x11a   :  { %v195_v36 = vpop.xlane.xlu1 %194  ;;  %v2104_v39 = vpop.xlane.xlu0 %191 }
 0x11b   :  { %v1339_v48 = vmul.f32 -1.442695, %v195_v36  ;;  %v1338_v49 = vmul.f32 -1.442695, %v2104_v39 }
 0x11d   :  { %1451 = vpow2.f32 %v1339_v48 }
 0x11e   :  { %1453 = vpow2.f32 %v1338_v49  ;;  %v2107_v63 = vpop.xlane.xlu1 %197  ;;  %v2109_v15 = vpop.xlane.xlu0 %209 }
 0x11f   :  { %v1340_v20 = vmul.f32 -1.442695, %v2107_v63  ;;  %v1344_v26 = vmul.f32 -1.442695, %v2109_v15 }
 0x121   :  { %1455 = vpow2.f32 %v1340_v20 }
 0x122   :  { %v2113_v30 = vpop.xlane.xlu1 %200  ;;  %v2115_v31 = vpop.xlane.xlu0 %212 }
 0x123   :  { %v1341_v37 = vmul.f32 -1.442695, %v2113_v30  ;;  %v1345_v38 = vmul.f32 -1.442695, %v2115_v31 }
 0x125   :  { %1457 = vpow2.f32 %v1341_v37 }
 0x126   :  { %1459 = vpow2.f32 %v1344_v26  ;;  %v2119_v42 = vpop.xlane.xlu1 %203  ;;  %v2121_v43 = vpop.xlane.xlu0 %245  ;;  %v934_v26 = vadd.s32 4294967264, %v1767_v7 }
 0x127   :  { %v1452_v50 = vpop.eup %1451  ;;  %1461 = vpow2.f32 %v1345_v38  ;;  %v1342_v51 = vmul.f32 -1.442695, %v2119_v42  ;;  %v1356_v32 = vmul.f32 -1.442695, %v2121_v43  ;;  %v948_v38 = vadd.s32 4294967248, %v1767_v7 }
 0x128   :  { %v1454_v54 = vpop.eup %1453  ;;  %v575_v56 = vadd.f32 1.0, %v1452_v50 }
 0x129   :  { %v574_v59 = vadd.f32 1.0, %v1454_v54  ;;  %1463 = vpow2.f32 %v1342_v51 }
 0x12a   :  { %1465 = vrcp.f32 %v575_v56  ;;  %v2124_v60 = vpop.xlane.xlu1 %206  ;;  %v2126_v0 = vpop.xlane.xlu0 %227 }
 0x12b   :  { %v1456_v1 = vpop.eup %1455  ;;  %1467 = vrcp.f32 %v574_v59  ;;  %v1343_v4 = vmul.f32 -1.442695, %v2124_v60  ;;  %v1350_v34 = vmul.f32 -1.442695, %v2126_v0 }
 0x12c   :  { %v576_v5 = vadd.f32 1.0, %v1456_v1 }
 0x12d   :  { %1469 = vpow2.f32 %v1343_v4  ;;  %v955_v4 = vadd.s32 4294967240, %v1767_v7 }
 0x12e   :  { %1471 = vrcp.f32 %v576_v5  ;;  %v2130_v12 = vpop.xlane.xlu1 %215  ;;  %v2132_v24 = vpop.xlane.xlu0 %290  ;;  %v941_v5 = vadd.s32 4294967256, %v1767_v7 }
 0x12f   :  { %v1458_v27 = vpop.eup %1457  ;;  %v1346_v33 = vmul.f32 -1.442695, %v2130_v12  ;;  %v1371_v19 = vmul.f32 -1.442695, %v2132_v24 }
 0x130   :  { %v1460_v41 = vpop.eup %1459  ;;  %v577_v45 = vadd.f32 1.0, %v1458_v27 }
 0x131   :  { %v1462_v53 = vpop.eup %1461  ;;  %1473 = vpow2.f32 %v1346_v33  ;;  %v580_v16 = vadd.f32 1.0, %v1460_v41  ;;  %v2187_v41 = vsub.s32 %v934_v26, %v1765_v6  ;;  %v1734_v26 = vmov 0.0|0.0  }
 0x132   :  { %1475 = vrcp.f32 %v577_v45  ;;  %v2140_v2 = vpop.xlane.xlu1 %218  ;;  %v2142_v3 = vpop.xlane.xlu0 %230  ;;  %v581_v55 = vadd.f32 1.0, %v1462_v53  ;;  %1432 = vmatprep.subr.bf16.mxu0 %v1734_v26 }
 0x133   :  { %v1464_v8 = vpop.eup %1463  ;;  %1477 = vpow2.f32 %v1356_v32  ;;  %v1347_v21 = vmul.f32 -1.442695, %v2140_v2  ;;  %v1351_v51 = vmul.f32 -1.442695, %v2142_v3 }
 0x134   :  { %v1466_v29 = vpop.eup %1465  ;;  %v578_v17 = vadd.f32 1.0, %v1464_v8  ;;  %1479 = vpow2.f32 %v1350_v34  ;;  %v2191_v34 = vsub.s32 %v948_v38, %v1765_v6 }
 0x135   :  { %v1468_v25 = vpop.eup %1467  ;;  %v767_v40 = vmul.f32 %v1466_v29, %v195_v36  ;;  %1481 = vpow2.f32 %v1347_v21  ;;  %v2166_v36 = vsub.s32 %v927_v52, %v1765_v6 }
 0x136   :  { %v766_v47 = vmul.f32 %v1468_v25, %v2104_v39  ;;  %1483 = vrcp.f32 %v578_v17  ;;  %v2153_v18 = vpop.xlane.xlu1 %221  ;;  %v2155_v44 = vpop.xlane.xlu0 %254  ;;  %v2200_v17 = vsub.s32 %v941_v5, %v1765_v6 }
 0x137   :  { %v1470_v57 = vpop.eup %1469  ;;  %v917_v58 = vrot.slane %v767_v40, %v2138_v62  ;;  %1485 = vrcp.f32 %v580_v16  ;;  %v1348_v22 = vmul.f32 -1.442695, %v2153_v18  ;;  %v1359_v21 = vmul.f32 -1.442695, %v2155_v44 }
 0x138   :  { %v1472_v13 = vpop.eup %1471  ;;  %v912_v14 = vrot.slane %v766_v47, %v2148_v28  ;;  %1487 = vrcp.f32 %v581_v55  ;;  %v579_v23 = vadd.f32 1.0, %v1470_v57  ;;  %v2197_v55 = vsub.s32 %v955_v4, %v1765_v6  ;;  %v830_v57 = vld [vmem:[%s2581_s2] sm:$0xff]  ;;  %v831_v6 = vld [vmem:[%s2581_s2 + $0x8] sm:$0xff] }
 0x139   :  { %v768_v35 = vmul.f32 %v1472_v13, %v2107_v63  ;;  %1489 = vpow2.f32 %v1371_v19  ;;  %v1433_v13 = vpack.c.bf16 %v831_v6, %v830_v57 }
 0x13a   :  { %v919_v46 = vsel %vm918_vm2, %v917_v58, %v912_v14  ;;  %1491 = vrcp.f32 %v579_v23  ;;  %v2168_v39 = vpop.xlane.xlu1 %239  ;;  %v2170_v48 = vpop.xlane.xlu0 %296  ;;  %v832_v14 = vld [vmem:[%s2581_s2 + $0x10] sm:$0xff]  ;;  %v833_v23 = vld [vmem:[%s2581_s2 + $0x18] sm:$0xff] }
 0x13b   :  { %v1474_v49 = vpop.eup %1473  ;;  %v924_v20 = vrot.slane %v768_v35, %v2159_v61  ;;  %1493 = vpow2.f32 %v1348_v22  ;;  %v1354_v63 = vmul.f32 -1.442695, %v2168_v39  ;;  %1434 = vmatpush3.bf16.msra.mxu0 %v1433_v13  ;;  %v1436_v38 = vpack.c.bf16 %v833_v23, %v832_v14 }
 0x13c   :  { %v1476_v37 = vpop.eup %1475  ;;  %v582_v50 = vadd.f32 1.0, %v1474_v49  ;;  %1435 = vmatprep.subr.bf16.mxu0 %v1734_v26 }
 0x13d   :  { %v1478_v54 = vpop.eup %1477  ;;  %v926_v56 = vsel %vm925_vm3, %v924_v20, %v919_v46  ;;  %v769_v59 = vmul.f32 %v1476_v37, %v2113_v30 }
 0x13e   :  { %v1480_v1 = vpop.eup %1479  ;;  %1495 = vrcp.f32 %v582_v50  ;;  %v2181_v11 = vpop.xlane.xlu1 %242  ;;  %v592_v53 = vadd.f32 1.0, %v1478_v54  ;;  %v835_v54 = vld [vmem:[%s2581_s2 + $0x28] sm:$0xff] }
 0x13f   :  { %v2183_v27 = vpop.xlane.xlu0 %257  ;;  %v1482_v32 = vpop.eup %1481  ;;  %v931_v33 = vrot.slane %v769_v59, %v2166_v36  ;;  %1497 = vpow2.f32 %v1354_v63  ;;  %v1355_v30 = vmul.f32 -1.442695, %v2181_v11  ;;  %v586_v52 = vadd.f32 1.0, %v1480_v1  ;;  %1437 = vmatpush3.bf16.msra.mxu0 %v1436_v38 }
 0x140   :  { %v1484_v45 = vpop.eup %1483  ;;  %v583_v7 = vadd.f32 1.0, %v1482_v32  ;;  %1499 = vpow2.f32 %v1351_v51  ;;  %1438 = vmatprep.subr.bf16.mxu0 %v1734_v26 }
 0x141   :  { %v1486_v8 = vpop.eup %1485  ;;  %v933_v9 = vsel %vm932_vm4, %v931_v33, %v926_v56  ;;  %v770_v16 = vmul.f32 %v1484_v45, %v2119_v42  ;;  %v1360_v33 = vmul.f32 -1.442695, %v2183_v27 }
 0x142   :  { %v1488_v29 = vpop.eup %1487  ;;  %1501 = vrcp.f32 %v583_v7  ;;  %v2202_v25 = vpop.xlane.xlu1 %224  ;;  %v772_v22 = vmul.f32 %v1486_v8, %v2109_v15 }
 0x143   :  { %v2204_v40 = vpop.xlane.xlu0 %299  ;;  %v1490_v19 = vpop.eup %1489  ;;  %v938_v47 = vrot.slane %v770_v16, %v2187_v41  ;;  %1503 = vpow2.f32 %v1355_v30  ;;  %v1349_v42 = vmul.f32 -1.442695, %v2202_v25  ;;  %v773_v46 = vmul.f32 %v1488_v29, %v2115_v31  ;;  %v837_v29 = vld [vmem:[%s2581_s2 + $0x38] sm:$0xff] }
 0x144   :  { %v1492_v58 = vpop.eup %1491  ;;  %1505 = vrcp.f32 %v592_v53  ;;  %v1373_v31 = vmul.f32 -1.442695, %v2170_v48  ;;  %v952_v59 = vrot.slane %v772_v22, %v2191_v34  ;;  %v607_v1 = vadd.f32 1.0, %v1490_v19 }
 0x145   :  { %v1494_v35 = vpop.eup %1493  ;;  %v940_v49 = vsel %vm939_vm5, %v938_v47, %v933_v9  ;;  %v771_v20 = vmul.f32 %v1492_v58, %v2124_v60  ;;  %1507 = vpow2.f32 %v1359_v21  ;;  %v834_v60 = vld [vmem:[%s2581_s2 + $0x20] sm:$0xff]  ;;  %v959_v5 = vrot.slane %v773_v46, %v2197_v55  ;;  %v836_v21 = vld [vmem:[%s2581_s2 + $0x30] sm:$0xff] }
 0x146   :  { %v584_v15 = vadd.f32 1.0, %v1494_v35  ;;  %1509 = vpow2.f32 %v1349_v42  ;;  %v2224_v63 = vpop.xlane.xlu1 %248  ;;  %v1439_v9 = vpack.c.bf16 %v835_v54, %v834_v60  ;;  %v1374_v58 = vmul.f32 -1.442695, %v2204_v40 }
 0x147   :  { %v2226_v37 = vpop.xlane.xlu0 %305  ;;  %v945_v50 = vrot.slane %v771_v20, %v2200_v17  ;;  %1511 = vrcp.f32 %v586_v52  ;;  %v1357_v51 = vmul.f32 -1.442695, %v2224_v63  ;;  %v1442_v14 = vpack.c.bf16 %v837_v29, %v836_v21 }
 0x148   :  { %v1496_v56 = vpop.eup %1495  ;;  %1513 = vrcp.f32 %v584_v15  ;;  %1440 = vmatpush3.bf16.msra.mxu0 %v1439_v9 }
 0x149   :  { %v1498_v4 = vpop.eup %1497  ;;  %v947_v32 = vsel %vm946_vm6, %v945_v50, %v940_v49  ;;  %1515 = vpow2.f32 %v1357_v51  ;;  %v774_v16 = vmul.f32 %v1496_v56, %v2130_v12  ;;  %1441 = vmatprep.subr.bf16.mxu0 %v1734_v26  ;;  %v1376_v49 = vmul.f32 -1.442695, %v2226_v37 }
 0x14a   :  { %v1500_v30 = vpop.eup %1499  ;;  %v954_v45 = vsel %vm953_vm7, %v952_v59, %v947_v32  ;;  %v590_v53 = vadd.f32 1.0, %v1498_v4  ;;  %v2244_v8 = vpop.xlane.xlu1 %287  ;;  %1517 = vpow2.f32 %v1373_v31 }
 0x14b   :  { %v2242_v7 = vpop.xlane.xlu0 %308  ;;  %v1370_v47 = vmul.f32 -1.442695, %v2244_v8  ;;  %v2256_v52 = vsel %vm960_vm8, %v959_v5, %v954_v45  ;;  %v587_v42 = vadd.f32 1.0, %v1500_v30  ;;  %v965_v35 = vrot.slane %v774_v16, %v2148_v28 }
 0x14c   :  { %v1502_v19 = vpop.eup %1501  ;;  %1519 = vrcp.f32 %v590_v53  ;;  %v1377_v51 = vmul.f32 -1.442695, %v2242_v7  ;;  %1443 = vmatpush3.bf16.msra.mxu0 %v1442_v14 }
 0x14d   :  { %v1504_v10 = vpop.eup %1503  ;;  %v775_v12 = vmul.f32 %v1502_v19, %v2140_v2  ;;  %1521 = vpow2.f32 %v1360_v33 }
 0x14e   :  { %v1506_v57 = vpop.eup %1505  ;;  %1523 = vrcp.f32 %v607_v1  ;;  %v591_v6 = vadd.f32 1.0, %v1504_v10  ;;  %v2262_v13 = vpop.xlane.xlu1 %251 }
 0x14f   :  { %v2260_v22 = vpop.xlane.xlu0 %266  ;;  %v1508_v23 = vpop.eup %1507  ;;  %v969_v46 = vrot.slane %v775_v12, %v2138_v62  ;;  %1525 = vpow2.f32 %v1370_v47  ;;  %v1358_v50 = vmul.f32 -1.442695, %v2262_v13  ;;  %v784_v12 = vmul.f32 %v1506_v57, %v2121_v43 }
 0x150   :  { %v1510_v2 = vpop.eup %1509  ;;  %1527 = vrcp.f32 %v591_v6  ;;  %v595_v59 = vadd.f32 1.0, %v1508_v23  ;;  %v1363_v30 = vmul.f32 -1.442695, %v2260_v22 }
 0x151   :  { %v1512_v20 = vpop.eup %1511  ;;  %v970_v15 = vsel %vm918_vm2, %v969_v46, %v965_v35  ;;  %1529 = vrcp.f32 %v587_v42  ;;  %v585_v38 = vadd.f32 1.0, %v1510_v2 }
 0x152   :  { %v1514_v31 = vpop.eup %1513  ;;  %1531 = vpow2.f32 %v1374_v58  ;;  %v2272_v54 = vpop.xlane.xlu1 %293  ;;  %v778_v2 = vmul.f32 %v1512_v20, %v2126_v0 }
 0x153   :  { %v2270_v60 = vpop.xlane.xlu0 %269  ;;  %v776_v26 = vmul.f32 %v1514_v31, %v2153_v18  ;;  %1533 = vrcp.f32 %v585_v38  ;;  %v1516_v56 = vpop.eup %1515  ;;  %v1372_v32 = vmul.f32 -1.442695, %v2272_v54  ;;  %v1013_v31 = vrot.slane %v784_v12, %v2159_v61 }
 0x154   :  { %1535 = vpow2.f32 %v1376_v49  ;;  %v1518_v1 = vpop.eup %1517  ;;  %v593_v5 = vadd.f32 1.0, %v1516_v56  ;;  %v1364_v16 = vmul.f32 -1.442695, %v2270_v60 }
 0x155   :  { %v974_v4 = vrot.slane %v776_v26, %v2159_v61  ;;  %1537 = vpow2.f32 %v1358_v50  ;;  %v609_v49 = vadd.f32 1.0, %v1518_v1 }
 0x156   :  { %v1520_v33 = vpop.eup %1519  ;;  %1539 = vpow2.f32 %v1377_v51  ;;  %v2280_v53 = vpop.xlane.xlu1 %233 }
 0x157   :  { %v2278_v45 = vpop.xlane.xlu0 %272  ;;  %v1522_v18 = vpop.eup %1521  ;;  %v975_v9 = vsel %vm925_vm3, %v974_v4, %v970_v15  ;;  %1541 = vrcp.f32 %v593_v5  ;;  %v782_v19 = vmul.f32 %v1520_v33, %v2168_v39  ;;  %v1352_v47 = vmul.f32 -1.442695, %v2280_v53 }
 0x158   :  { %v2284_v21 = vpop.eup %1523  ;;  %1543 = vrcp.f32 %v595_v59  ;;  %v596_v42 = vadd.f32 1.0, %v1522_v18  ;;  %v1365_v38 = vmul.f32 -1.442695, %v2278_v45  ;;  %v984_v33 = vrot.slane %v778_v2, %v2187_v41 }
 0x159   :  { %v1526_v29 = vpop.eup %1525  ;;  %1545 = vpow2.f32 %v1372_v32  ;;  %v1004_v43 = vrot.slane %v782_v19, %v2148_v28  ;;  %v799_v2 = vmul.f32 %v2284_v21, %v2132_v24 }
 0x15a   :  { %v1528_v10 = vpop.eup %1527  ;;  %v606_v6 = vadd.f32 1.0, %v1526_v29  ;;  %1547 = vpow2.f32 %v1363_v30  ;;  %v2289_v58 = vpop.xlane.xlu1 %236 }
 0x15b   :  { %v2291_v14 = vpop.xlane.xlu0 %311  ;;  %v1530_v23 = vpop.eup %1529  ;;  %v783_v35 = vmul.f32 %v1528_v10, %v2181_v11  ;;  %1549 = vpow2.f32 %v1364_v16  ;;  %v1353_v46 = vmul.f32 -1.442695, %v2289_v58  ;;  %v1086_v24 = vrot.slane %v799_v2, %v2138_v62 }
 0x15c   :  { %v1532_v39 = vpop.eup %1531  ;;  %1551 = vrcp.f32 %v606_v6  ;;  %v779_v11 = vmul.f32 %v1530_v23, %v2142_v3 }
 0x15d   :  { %v1534_v15 = vpop.eup %1533  ;;  %v1008_v57 = vrot.slane %v783_v35, %v2138_v62  ;;  %1553 = vpow2.f32 %v1352_v47  ;;  %v610_v59 = vadd.f32 1.0, %v1532_v39 }
 0x15e   :  { %v1536_v50 = vpop.eup %1535  ;;  %1555 = vrcp.f32 %v596_v42  ;;  %v777_v51 = vmul.f32 %v1534_v15, %v2202_v25  ;;  %v2302_v26 = vpop.xlane.xlu1 %260  ;;  %v989_v16 = vrot.slane %v779_v11, %v2200_v17 }
 0x15f   :  { %v2304_v0 = vpop.xlane.xlu0 %335  ;;  %v1538_v20 = vpop.eup %1537  ;;  %v1009_v56 = vsel %vm918_vm2, %v1008_v57, %v1004_v43  ;;  %1557 = vpow2.f32 %v1353_v46  ;;  %v612_v25 = vadd.f32 1.0, %v1536_v50  ;;  %v1361_v30 = vmul.f32 -1.442695, %v2302_v26 }
 0x160   :  { %v1540_v1 = vpop.eup %1539  ;;  %1559 = vrcp.f32 %v609_v49  ;;  %v979_v4 = vrot.slane %v777_v51, %v2166_v36  ;;  %v1014_v5 = vsel %vm925_vm3, %v1013_v31, %v1009_v56  ;;  %v594_v32 = vadd.f32 1.0, %v1538_v20 }
 0x161   :  { %v1542_v3 = vpop.eup %1541  ;;  %1561 = vpow2.f32 %v1365_v38  ;;  %v613_v42 = vadd.f32 1.0, %v1540_v1  ;;  %v1378_v49 = vmul.f32 -1.442695, %v2291_v14 }
 0x162   :  { %v1544_v18 = vpop.eup %1543  ;;  %v980_v29 = vsel %vm932_vm4, %v979_v4, %v975_v9  ;;  %v785_v19 = vmul.f32 %v1542_v3, %v2224_v63  ;;  %1563 = vrcp.f32 %v594_v32  ;;  %v2314_v47 = vpop.xlane.xlu1 %302 }
 0x163   :  { %v1546_v10 = vpop.eup %1545  ;;  %v985_v12 = vsel %vm939_vm5, %v984_v33, %v980_v29  ;;  %1565 = vrcp.f32 %v610_v59  ;;  %v1375_v6 = vmul.f32 -1.442695, %v2314_v47  ;;  %v2318_v23 = vpop.xlane.xlu0 %341  ;;  %v787_v4 = vmul.f32 %v1544_v18, %v2155_v44 }
 0x164   :  { %v1548_v35 = vpop.eup %1547  ;;  %v1018_v46 = vrot.slane %v785_v19, %v2166_v36  ;;  %v608_v39 = vadd.f32 1.0, %v1546_v10  ;;  %v2322_v9 = vsel %vm946_vm6, %v989_v16, %v985_v12  ;;  %1567 = vpow2.f32 %v1361_v30 }
 0x165   :  { %v1550_v63 = vpop.eup %1549  ;;  %1569 = vrcp.f32 %v612_v25  ;;  %v599_v56 = vadd.f32 1.0, %v1548_v35  ;;  %v1386_v16 = vmul.f32 -1.442695, %v2304_v0  ;;  %v1028_v10 = vrot.slane %v787_v4, %v2200_v17 }
 0x166   :  { %v1552_v15 = vpop.eup %1551  ;;  %v1019_v43 = vsel %vm932_vm4, %v1018_v46, %v1014_v5  ;;  %1571 = vrcp.f32 %v608_v39  ;;  %v2328_v57 = vpop.xlane.xlu1 %263  ;;  %v600_v5 = vadd.f32 1.0, %v1550_v63 }
 0x167   :  { %v1554_v38 = vpop.eup %1553  ;;  %1573 = vrcp.f32 %v613_v42  ;;  %v798_v50 = vmul.f32 %v1552_v15, %v2244_v8  ;;  %v1362_v31 = vmul.f32 -1.442695, %v2328_v57  ;;  %v2334_v59 = vpop.xlane.xlu0 %281 }
 0x168   :  { %v1556_v11 = vpop.eup %1555  ;;  %v588_v51 = vadd.f32 1.0, %v1554_v38  ;;  %1575 = vpow2.f32 %v1375_v6 }
 0x169   :  { %v1558_v20 = vpop.eup %1557  ;;  %v1082_v21 = vrot.slane %v798_v50, %v2148_v28  ;;  %1577 = vpow2.f32 %v1378_v49  ;;  %v788_v30 = vmul.f32 %v1556_v11, %v2183_v27  ;;  %v1388_v49 = vmul.f32 -1.442695, %v2318_v23 }
 0x16a   :  { %v1560_v1 = vpop.eup %1559  ;;  %1579 = vrcp.f32 %v588_v51  ;;  %v589_v8 = vadd.f32 1.0, %v1558_v20  ;;  %v2337_v32 = vpop.xlane.xlu1 %314 }
 0x16b   :  { %v1562_v3 = vpop.eup %1561  ;;  %v1087_v33 = vsel %vm918_vm2, %v1086_v24, %v1082_v21  ;;  %1581 = vpow2.f32 %v1362_v31  ;;  %v1379_v29 = vmul.f32 -1.442695, %v2337_v32  ;;  %v2348_v46 = vpop.xlane.xlu0 %323  ;;  %v801_v2 = vmul.f32 %v1560_v1, %v2170_v48 }
 0x16c   :  { %v1564_v25 = vpop.eup %1563  ;;  %1583 = vrcp.f32 %v589_v8  ;;  %v601_v12 = vadd.f32 1.0, %v1562_v3 }
 0x16d   :  { %v1566_v19 = vpop.eup %1565  ;;  %1585 = vrcp.f32 %v599_v56  ;;  %v786_v44 = vmul.f32 %v1564_v25, %v2262_v13  ;;  %v1033_v13 = vrot.slane %v788_v30, %v2191_v34 }
 0x16e   :  { %v1568_v18 = vpop.eup %1567  ;;  %1587 = vrcp.f32 %v600_v5  ;;  %v2345_v42 = vpop.xlane.xlu1 %275  ;;  %v802_v38 = vmul.f32 %v1566_v19, %v2204_v40  ;;  %v1096_v40 = vrot.slane %v801_v2, %v2166_v36  ;;  %v1368_v19 = vmul.f32 -1.442695, %v2334_v59 }
 0x16f   :  { %v1570_v6 = vpop.eup %1569  ;;  %v1023_v35 = vrot.slane %v786_v44, %v2187_v41  ;;  %v597_v27 = vadd.f32 1.0, %v1568_v18  ;;  %1589 = vpow2.f32 %v1379_v29  ;;  %v1366_v39 = vmul.f32 -1.442695, %v2345_v42  ;;  %v2369_v3 = vpop.xlane.xlu0 %347 }
 0x170   :  { %v1572_v63 = vpop.eup %1571  ;;  %1591 = vpow2.f32 %v1386_v16  ;;  %v1101_v4 = vrot.slane %v802_v38, %v2187_v41 }
 0x171   :  { %v2354_v15 = vpop.eup %1573  ;;  %v1024_v50 = vsel %vm939_vm5, %v1023_v35, %v1019_v43  ;;  %v800_v31 = vmul.f32 %v1572_v63, %v2272_v54  ;;  %1593 = vrcp.f32 %v597_v27  ;;  %v1382_v35 = vmul.f32 -1.442695, %v2348_v46 }
 0x172   :  { %v1576_v11 = vpop.eup %1575  ;;  %v1029_v51 = vsel %vm946_vm6, %v1028_v10, %v1024_v50  ;;  %1595 = vrcp.f32 %v601_v12  ;;  %v2360_v20 = vpop.xlane.xlu1 %317  ;;  %v804_v50 = vmul.f32 %v1570_v6, %v2226_v37 }
 0x173   :  { %v1578_v48 = vpop.eup %1577  ;;  %v1091_v24 = vrot.slane %v800_v31, %v2159_v61  ;;  %v1034_v21 = vsel %vm953_vm7, %v1033_v13, %v1029_v51  ;;  %v611_v56 = vadd.f32 1.0, %v1576_v11  ;;  %1597 = vpow2.f32 %v1366_v39  ;;  %v2387_v11 = vpop.xlane.xlu0 %350 }
 0x174   :  { %v1580_v1 = vpop.eup %1579  ;;  %1599 = vpow2.f32 %v1388_v49  ;;  %v1380_v54 = vmul.f32 -1.442695, %v2360_v20  ;;  %v614_v16 = vadd.f32 1.0, %v1578_v48  ;;  %v1390_v49 = vmul.f32 -1.442695, %v2369_v3 }
 0x175   :  { %v1582_v43 = vpop.eup %1581  ;;  %v1092_v5 = vsel %vm925_vm3, %v1091_v24, %v1087_v33  ;;  %v780_v8 = vmul.f32 %v1580_v1, %v2280_v53  ;;  %1601 = vrcp.f32 %v611_v56 }
 0x176   :  { %v1584_v25 = vpop.eup %1583  ;;  %v1097_v30 = vsel %vm932_vm4, %v1096_v40, %v1092_v5  ;;  %v598_v29 = vadd.f32 1.0, %v1582_v43  ;;  %v2373_v44 = vpop.xlane.xlu1 %338  ;;  %1603 = vpow2.f32 %v1380_v54 }
 0x177   :  { %v1586_v18 = vpop.eup %1585  ;;  %v994_v10 = vrot.slane %v780_v8, %v2191_v34  ;;  %v781_v12 = vmul.f32 %v1584_v25, %v2289_v58  ;;  %v1102_v33 = vsel %vm939_vm5, %v1101_v4, %v1097_v30  ;;  %v1387_v6 = vmul.f32 -1.442695, %v2373_v44 }
 0x178   :  { %v1588_v53 = vpop.eup %1587  ;;  %1605 = vrcp.f32 %v598_v29  ;;  %v1111_v4 = vrot.slane %v804_v50, %v2191_v34  ;;  %v791_v5 = vmul.f32 %v1586_v18, %v2260_v22 }
 0x179   :  { %v1590_v27 = vpop.eup %1589  ;;  %v995_v39 = vsel %vm953_vm7, %v994_v10, %v2322_v9  ;;  %v999_v63 = vrot.slane %v781_v12, %v2197_v55  ;;  %1607 = vpow2.f32 %v1368_v19 }
 0x17a   :  { %v1592_v2 = vpop.eup %1591  ;;  %v615_v13 = vadd.f32 1.0, %v1590_v27  ;;  %v2383_v58 = vpop.xlane.xlu1 %278  ;;  %1609 = vrcp.f32 %v614_v16  ;;  %v792_v16 = vmul.f32 %v1588_v53, %v2270_v60 }
 0x17b   :  { %v1594_v38 = vpop.eup %1593  ;;  %v1000_v31 = vsel %vm960_vm8, %v999_v63, %v995_v39  ;;  %v1367_v9 = vmul.f32 -1.442695, %v2383_v58  ;;  %1611 = vpow2.f32 %v1382_v35  ;;  %v622_v10 = vadd.f32 1.0, %v1592_v2 }
 0x17c   :  { %v1596_v51 = vpop.eup %1595  ;;  %v1236_v48 = vsel %vm1235_vm10, %v1000_v31, %v2256_v52  ;;  %v789_v24 = vmul.f32 %v1594_v38, %v2302_v26  ;;  %1613 = vrcp.f32 %v615_v13  ;;  %v805_v52 = vmul.f32 %v2354_v15, %v2242_v7  ;;  %v2408_v7 = vpop.xlane.xlu0 %332 }
 0x17d   :  { %v1598_v56 = vpop.eup %1597  ;;  %1615 = vpow2.f32 %v1390_v49  ;;  %v793_v29 = vmul.f32 %v1596_v51, %v2278_v45  ;;  %v1391_v45 = vmul.f32 -1.442695, %v2387_v11  ;;  %v1047_v35 = vrot.slane %v791_v5, %v2138_v62 }
 0x17e   :  { %v1600_v1 = vpop.eup %1599  ;;  %v1038_v40 = vrot.slane %v789_v24, %v2197_v55  ;;  %v602_v37 = vadd.f32 1.0, %v1598_v56  ;;  %v2394_v54 = vpop.xlane.xlu1 %320  ;;  %1617 = vpow2.f32 %v1367_v9  ;;  %v1385_v49 = vmul.f32 -1.442695, %v2408_v7 }
 0x17f   :  { %v1602_v43 = vpop.eup %1601  ;;  %v1381_v26 = vmul.f32 -1.442695, %v2394_v54  ;;  %v624_v22 = vadd.f32 1.0, %v1600_v1  ;;  %v1052_v38 = vrot.slane %v792_v16, %v2159_v61  ;;  %v1057_v50 = vrot.slane %v793_v29, %v2166_v36 }
 0x180   :  { %v1039_v8 = vsel %vm960_vm8, %v1038_v40, %v1034_v21  ;;  %v803_v25 = vmul.f32 %v1602_v43, %v2314_v47  ;;  %1619 = vrcp.f32 %v602_v37  ;;  %v1604_v30 = vpop.eup %1603  ;;  %v1116_v47 = vrot.slane %v805_v52, %v2197_v55  ;;  %v2430_v24 = vpop.xlane.xlu0 %362 }
 0x181   :  { %v2406_v19 = vsel %vm1237_vm11, %v1039_v8, %v1236_v48  ;;  %v616_v18 = vadd.f32 1.0, %v1604_v30  ;;  %1621 = vpow2.f32 %v1387_v6 }
 0x182   :  { %v1606_v15 = vpop.eup %1605  ;;  %v1106_v12 = vrot.slane %v803_v25, %v2200_v17  ;;  %v2411_v21 = vpop.xlane.xlu1 %344  ;;  %1623 = vpow2.f32 %v1381_v26 }
 0x183   :  { %v790_v60 = vmul.f32 %v1606_v15, %v2328_v57  ;;  %v1608_v53 = vpop.eup %1607  ;;  %1625 = vrcp.f32 %v616_v18  ;;  %v1389_v39 = vmul.f32 -1.442695, %v2411_v21  ;;  %v1395_v18 = vmul.f32 -1.442695, %v2430_v24 }
 0x184   :  { %v1107_v27 = vsel %vm946_vm6, %v1106_v12, %v1102_v33  ;;  %v1610_v63 = vpop.eup %1609  ;;  %1627 = vrcp.f32 %v622_v10  ;;  %v604_v48 = vadd.f32 1.0, %v1608_v53  ;;  %v2442_v12 = vpop.xlane.xlu0 %365 }
 0x185   :  { %v1112_v2 = vsel %vm953_vm7, %v1111_v4, %v1107_v27  ;;  %v1043_v13 = vrot.slane %v790_v60, %v2148_v28  ;;  %v1612_v57 = vpop.eup %1611  ;;  %1629 = vrcp.f32 %v624_v22  ;;  %v806_v16 = vmul.f32 %v1610_v63, %v2291_v14 }
 0x186   :  { %v2424_v31 = vpop.xlane.xlu1 %284  ;;  %v2427_v33 = vsel %vm960_vm8, %v1116_v47, %v1112_v2  ;;  %v1614_v9 = vpop.eup %1613  ;;  %1631 = vpow2.f32 %v1391_v45  ;;  %v618_v6 = vadd.f32 1.0, %v1612_v57 }
 0x187   :  { %v1048_v51 = vsel %vm918_vm2, %v1047_v35, %v1043_v13  ;;  %v1369_v56 = vmul.f32 -1.442695, %v2424_v31  ;;  %v1616_v1 = vpop.eup %1615  ;;  %1633 = vpow2.f32 %v1389_v39  ;;  %v807_v52 = vmul.f32 %v1614_v9, %v2337_v32 }
 0x188   :  { %v1053_v40 = vsel %vm925_vm3, %v1052_v38, %v1048_v51  ;;  %v1618_v37 = vpop.eup %1617  ;;  %1635 = vpow2.f32 %v1385_v49  ;;  %v626_v29 = vadd.f32 1.0, %v1616_v1  ;;  %v1121_v27 = vrot.slane %v806_v16, %v2148_v28  ;;  %v2462_v51 = vpop.xlane.xlu0 %374 }
 0x189   :  { %v1058_v43 = vsel %vm932_vm4, %v1057_v50, %v1053_v40  ;;  %v603_v26 = vadd.f32 1.0, %v1618_v37  ;;  %1637 = vpow2.f32 %v1369_v56  ;;  %v1125_v22 = vrot.slane %v807_v52, %v2138_v62 }
 0x18a   :  { %v1620_v4 = vpop.eup %1619  ;;  %v2436_v5 = vpop.xlane.xlu1 %326  ;;  %1639 = vrcp.f32 %v604_v48  ;;  %v1396_v13 = vmul.f32 -1.442695, %v2442_v12 }
 0x18b   :  { %v794_v8 = vmul.f32 %v1620_v4, %v2345_v42  ;;  %v1383_v25 = vmul.f32 -1.442695, %v2436_v5  ;;  %v1622_v30 = vpop.eup %1621  ;;  %1641 = vrcp.f32 %v603_v26  ;;  %v1126_v57 = vsel %vm918_vm2, %v1125_v22, %v1121_v27 }
 0x18c   :  { %v1624_v10 = vpop.eup %1623  ;;  %1643 = vrcp.f32 %v618_v6  ;;  %v623_v39 = vadd.f32 1.0, %v1622_v30  ;;  %v2470_v16 = vpop.xlane.xlu0 %377  ;;  %v1399_v22 = vmul.f32 -1.442695, %v2462_v51 }
 0x18d   :  { %v1062_v15 = vrot.slane %v794_v8, %v2187_v41  ;;  %v1626_v32 = vpop.eup %1625  ;;  %1645 = vpow2.f32 %v1383_v25  ;;  %v617_v45 = vadd.f32 1.0, %v1624_v10 }
 0x18e   :  { %v2446_v42 = vpop.xlane.xlu1 %329  ;;  %v1628_v47 = vpop.eup %1627  ;;  %v808_v14 = vmul.f32 %v1626_v32, %v2360_v20  ;;  %1647 = vrcp.f32 %v626_v29 }
 0x18f   :  { %v1063_v60 = vsel %vm939_vm5, %v1062_v15, %v1058_v43  ;;  %v1384_v53 = vmul.f32 -1.442695, %v2446_v42  ;;  %v2451_v35 = vpop.eup %1629 }
 0x190   :  { %v1632_v63 = vpop.eup %1631  ;;  %v1130_v2 = vrot.slane %v808_v14, %v2159_v61 }
 0x191   :  { %1649 = vpow2.f32 %v1384_v53  ;;  %v1634_v49 = vpop.eup %1633  ;;  %v627_v25 = vadd.f32 1.0, %v1632_v63  ;;  %v814_v63 = vmul.f32 %v1628_v47, %v2304_v0 }
 0x192   :  { %1651 = vpow2.f32 %v1395_v18  ;;  %v2457_v20 = vpop.xlane.xlu1 %353  ;;  %v1636_v38 = vpop.eup %1635  ;;  %v2460_v50 = vsel %vm925_vm3, %v1130_v2, %v1126_v57  ;;  %v625_v9 = vadd.f32 1.0, %v1634_v49 }
 0x193   :  { %1653 = vrcp.f32 %v617_v45  ;;  %v1638_v48 = vpop.eup %1637  ;;  %v1392_v56 = vmul.f32 -1.442695, %v2457_v20  ;;  %v621_v6 = vadd.f32 1.0, %v1636_v38  ;;  %v1400_v45 = vmul.f32 -1.442695, %v2470_v16 }
 0x194   :  { %1655 = vrcp.f32 %v623_v39  ;;  %v1640_v1 = vpop.eup %1639  ;;  %v605_v40 = vadd.f32 1.0, %v1638_v48  ;;  %v1160_v47 = vrot.slane %v814_v63, %v2148_v28 }
 0x195   :  { %1657 = vpow2.f32 %v1396_v13  ;;  %v1642_v37 = vpop.eup %1641 }
 0x196   :  { %1659 = vrcp.f32 %v625_v9  ;;  %v2465_v43 = vpop.xlane.xlu1 %356  ;;  %v1644_v4 = vpop.eup %1643  ;;  %v795_v52 = vmul.f32 %v1642_v37, %v2383_v58 }
 0x197   :  { %1661 = vrcp.f32 %v605_v40  ;;  %v1393_v26 = vmul.f32 -1.442695, %v2465_v43  ;;  %v1646_v8 = vpop.eup %1645  ;;  %v810_v49 = vmul.f32 %v1644_v4, %v2348_v46 }
 0x198   :  { %1663 = vpow2.f32 %v1392_v56  ;;  %v1067_v30 = vrot.slane %v795_v52, %v2200_v17  ;;  %v619_v29 = vadd.f32 1.0, %v1646_v8  ;;  %v2472_v10 = vpop.eup %1647 }
 0x199   :  { %1665 = vpow2.f32 %v1393_v26  ;;  %v1140_v37 = vrot.slane %v810_v49, %v2187_v41 }
 0x19a   :  { %1667 = vrcp.f32 %v621_v6  ;;  %v2474_v15 = vpop.xlane.xlu1 %359  ;;  %v1068_v58 = vsel %vm946_vm6, %v1067_v30, %v1063_v60  ;;  %v796_v60 = vmul.f32 %v1640_v1, %v2334_v59  ;;  %v816_v59 = vmul.f32 %v2451_v35, %v2318_v23 }
 0x19b   :  { %v1650_v32 = vpop.eup %1649  ;;  %1669 = vrcp.f32 %v619_v29  ;;  %v1394_v18 = vmul.f32 -1.442695, %v2474_v15 }
 0x19c   :  { %v1652_v14 = vpop.eup %1651  ;;  %1671 = vrcp.f32 %v627_v25  ;;  %v620_v53 = vadd.f32 1.0, %v1650_v32 }
 0x19d   :  { %v1654_v27 = vpop.eup %1653  ;;  %1673 = vpow2.f32 %v1394_v18  ;;  %v631_v52 = vadd.f32 1.0, %v1652_v14 }
 0x19e   :  { %v1656_v39 = vpop.eup %1655  ;;  %1675 = vrcp.f32 %v620_v53  ;;  %v2481_v2 = vpop.xlane.xlu1 %368  ;;  %v809_v9 = vmul.f32 %v1654_v27, %v2394_v54  ;;  %v1072_v54 = vrot.slane %v796_v60, %v2191_v34 }
 0x19f   :  { %v1658_v13 = vpop.eup %1657  ;;  %1677 = vpow2.f32 %v1399_v22  ;;  %v1397_v57 = vmul.f32 -1.442695, %v2481_v2  ;;  %v815_v56 = vmul.f32 %v1656_v39, %v2373_v44 }
 0x1a0   :  { %v1660_v38 = vpop.eup %1659  ;;  %1679 = vpow2.f32 %v1400_v45  ;;  %v1135_v26 = vrot.slane %v809_v9, %v2166_v36  ;;  %v1073_v30 = vsel %vm953_vm7, %v1072_v54, %v1068_v58  ;;  %v632_v32 = vadd.f32 1.0, %v1658_v13 }
 0x1a1   :  { %v1662_v48 = vpop.eup %1661  ;;  %1681 = vpow2.f32 %v1397_v57  ;;  %v817_v25 = vmul.f32 %v1660_v38, %v2411_v21  ;;  %v1169_v38 = vrot.slane %v816_v59, %v2159_v61 }
 0x1a2   :  { %v1664_v0 = vpop.eup %1663  ;;  %v797_v46 = vmul.f32 %v1662_v48, %v2424_v31  ;;  %v2492_v1 = vpop.xlane.xlu1 %371  ;;  %v1164_v31 = vrot.slane %v815_v56, %v2138_v62  ;;  %v1136_v39 = vsel %vm932_vm4, %v1135_v26, %v2460_v50  ;;  %v818_v50 = vmul.f32 %v2472_v10, %v2369_v3 }
 0x1a3   :  { %v1666_v40 = vpop.eup %1665  ;;  %v628_v6 = vadd.f32 1.0, %v1664_v0  ;;  %v1398_v44 = vmul.f32 -1.442695, %v2492_v1 }
 0x1a4   :  { %v1668_v4 = vpop.eup %1667  ;;  %v1077_v8 = vrot.slane %v797_v46, %v2197_v55  ;;  %v629_v23 = vadd.f32 1.0, %v1666_v40  ;;  %v1165_v49 = vsel %vm918_vm2, %v1164_v31, %v1160_v47 }
 0x1a5   :  { %v1670_v35 = vpop.eup %1669  ;;  %1683 = vrcp.f32 %v628_v6  ;;  %v813_v53 = vmul.f32 %v1668_v4, %v2408_v7  ;;  %v1174_v7 = vrot.slane %v817_v25, %v2166_v36 }
 0x1a6   :  { %v1672_v29 = vpop.eup %1671  ;;  %v1078_v22 = vsel %vm960_vm8, %v1077_v8, %v1073_v30  ;;  %v811_v18 = vmul.f32 %v1670_v35, %v2436_v5  ;;  %1685 = vrcp.f32 %v629_v23  ;;  %v2504_v14 = vpop.xlane.xlu1 %380 }
 0x1a7   :  { %v1674_v45 = vpop.eup %1673  ;;  %v1240_v27 = vsel %vm1239_vm12, %v1078_v22, %v2406_v19  ;;  %1687 = vpow2.f32 %v1398_v44  ;;  %v1401_v21 = vmul.f32 -1.442695, %v2504_v14  ;;  %v819_v48 = vmul.f32 %v1672_v29, %v2387_v11 }
 0x1a8   :  { %v1676_v58 = vpop.eup %1675  ;;  %v1145_v63 = vrot.slane %v811_v18, %v2200_v17  ;;  %v630_v13 = vadd.f32 1.0, %v1674_v45  ;;  %v1242_v5 = vsel %vm1241_vm13, %v2427_v33, %v1240_v27  ;;  %v1141_v33 = vsel %vm939_vm5, %v1140_v37, %v1136_v39 }
 0x1a9   :  { %v1678_v60 = vpop.eup %1677  ;;  %v812_v19 = vmul.f32 %v1676_v58, %v2446_v42  ;;  %1689 = vpow2.f32 %v1401_v21  ;;  %v1155_v0 = vrot.slane %v813_v53, %v2197_v55  ;;  %v1170_v42 = vsel %vm925_vm3, %v1169_v38, %v1165_v49 }
 0x1aa   :  { %v1680_v57 = vpop.eup %1679  ;;  %1691 = vrcp.f32 %v630_v13  ;;  %v1146_v47 = vsel %vm946_vm6, %v1145_v63, %v1141_v33  ;;  %v1175_v3 = vsel %vm932_vm4, %v1174_v7, %v1170_v42  ;;  %v635_v10 = vadd.f32 1.0, %v1678_v60 }
 0x1ab   :  { %v1682_v9 = vpop.eup %1681  ;;  %1693 = vrcp.f32 %v631_v52  ;;  %v1150_v56 = vrot.slane %v812_v19, %v2191_v34  ;;  %v1179_v11 = vrot.slane %v818_v50, %v2187_v41  ;;  %v636_v40 = vadd.f32 1.0, %v1680_v57 }
 0x1ac   :  { %v633_v59 = vadd.f32 1.0, %v1682_v9  ;;  %1695 = vrcp.f32 %v632_v32  ;;  %v1184_v8 = vrot.slane %v819_v48, %v2200_v17 }
 0x1ad   :  { %v1151_v46 = vsel %vm953_vm7, %v1150_v56, %v1146_v47  ;;  %v1180_v4 = vsel %vm939_vm5, %v1179_v11, %v1175_v3 }
 0x1ae   :  { %1697 = vrcp.f32 %v633_v59  ;;  %v1156_v54 = vsel %vm960_vm8, %v1155_v0, %v1151_v46  ;;  %v1185_v30 = vsel %vm946_vm6, %v1184_v8, %v1180_v4 }
 0x1af   :  { %v1684_v37 = vpop.eup %1683  ;;  %v1244_v6 = vsel %vm1243_vm14, %v1156_v54, %v1242_v5  ;;  %1699 = vrcp.f32 %v635_v10 }
 0x1b0   :  { %v1686_v44 = vpop.eup %1685  ;;  %v820_v52 = vmul.f32 %v1684_v37, %v2457_v20  ;;  %1701 = vrcp.f32 %v636_v40 }
 0x1b1   :  { %v1688_v26 = vpop.eup %1687  ;;  %v821_v23 = vmul.f32 %v1686_v44, %v2465_v43 }
 0x1b2   :  { %v1189_v35 = vrot.slane %v820_v52, %v2191_v34  ;;  %v634_v31 = vadd.f32 1.0, %v1688_v26 }
 0x1b3   :  { %v1690_v25 = vpop.eup %1689  ;;  %v1194_v29 = vrot.slane %v821_v23, %v2197_v55 }
 0x1b4   :  { %v1692_v32 = vpop.eup %1691  ;;  %v1190_v22 = vsel %vm953_vm7, %v1189_v35, %v1185_v30  ;;  %1703 = vrcp.f32 %v634_v31  ;;  %v637_v20 = vadd.f32 1.0, %v1690_v25 }
 0x1b5   :  { %v1694_v18 = vpop.eup %1693  ;;  %v1195_v45 = vsel %vm960_vm8, %v1194_v29, %v1190_v22  ;;  %v822_v43 = vmul.f32 %v1692_v32, %v2474_v15 }
 0x1b6   :  { %1705 = vrcp.f32 %v637_v20  ;;  %v1246_v53 = vsel %vm1245_vm15, %v1195_v45, %v1244_v6  ;;  %v1696_v27 = vpop.eup %1695  ;;  %v823_v58 = vmul.f32 %v1694_v18, %v2430_v24 }
 0x1b7   :  { %v1199_v39 = vrot.slane %v822_v43, %v2148_v28  ;;  %v824_v5 = vmul.f32 %v1696_v27, %v2442_v12 }
 0x1b8   :  { %v1698_v21 = vpop.eup %1697  ;;  %v1203_v49 = vrot.slane %v823_v58, %v2138_v62 }
 0x1b9   :  { %v825_v63 = vmul.f32 %v1698_v21, %v2481_v2  ;;  %v1700_v13 = vpop.eup %1699  ;;  %v1208_v38 = vrot.slane %v824_v5, %v2159_v61 }
 0x1ba   :  { %v1702_v60 = vpop.eup %1701  ;;  %v827_v19 = vmul.f32 %v1700_v13, %v2462_v51  ;;  %v1204_v15 = vsel %vm918_vm2, %v1203_v49, %v1199_v39 }
 0x1bb   :  { %v1213_v57 = vrot.slane %v825_v63, %v2166_v36  ;;  %v828_v24 = vmul.f32 %v1702_v60, %v2470_v16  ;;  %v1209_v50 = vsel %vm925_vm3, %v1208_v38, %v1204_v15 }
 0x1bc   :  { %v1223_v9 = vrot.slane %v827_v19, %v2200_v17  ;;  %v1402_v17 = vld [vmem:[%s2582_s3] ss:$0 sm:$0xff] }
 0x1bd   :  { %v1214_v51 = vsel %vm932_vm4, %v1213_v57, %v1209_v50  ;;  %v1228_v48 = vrot.slane %v828_v24, %v2191_v34 }
 0x1be   :  { %v1704_v7 = vpop.eup %1703 }
 0x1bf   :  { %v826_v28 = vmul.f32 %v1704_v7, %v2492_v1 }
 0x1c0   :  { %v1706_v2 = vpop.eup %1705 }
 0x1c1   :  { %v1218_v12 = vrot.slane %v826_v28, %v2187_v41  ;;  %v829_v62 = vmul.f32 %v1706_v2, %v2504_v14 }
 0x1c3   :  { %v1219_v36 = vsel %vm939_vm5, %v1218_v12, %v1214_v51  ;;  %v1233_v61 = vrot.slane %v829_v62, %v2197_v55 }
 0x1c4   :  { %v1224_v16 = vsel %vm946_vm6, %v1223_v9, %v1219_v36 }
 0x1c5   :  { %v1229_v1 = vsel %vm953_vm7, %v1228_v48, %v1224_v16 }
 0x1c6   :  { %v1234_v41 = vsel %vm960_vm8, %v1233_v61, %v1229_v1 }
 0x1c7   :  { %v1248_v33 = vsel %vm1247_vm0, %v1234_v41, %v1246_v53 }
 0x1c8   :  { %1430 = vmatmul.mubr.msk.f32.vlgmr.msra.gmra.mrb[0].mxu0 %vm1249_vm1, %v1248_v33 }
 0x29b   :  { %v1318_v34 = vpop.f32.mrb[0].mxu0 }
 0x29c   :  { %v1319_v14 = vadd.f32 %v1402_v17, %v1318_v34  ;;  %v1431_v56 = vpop.f32.mrb[1].mxu0 }
 0x29e   :  { %1322 = vst [vmem:[#allocation2] sm:$0xff] %v1319_v14 }
 0x29f   :  { %1718 = shalt.err (!%p1715_p4)
}
 0x2a0   :  { %s1719_s26 = scalar_lea.hbm %s2583_s4, 128 }
 0x2a1   :  { %p1720_p5 = scmp.ne.s32.totalorder %s2583_s4, %s1719_s26  ;;  %p1723_p6 = scmp.lt.u32.totalorder %s1719_s26, %s2583_s4 }
 0x2a3   :  { %p1725_p7 = pnand %p1723_p6, %p1720_p5 }
 0x2a5   :  { %1728 = shalt.err (!%p1725_p7)
}
 0x2a6   :  { %1332 = dma.vmem_to_hbm [thread:$0]  %s1330_s22, 128, %s2583_s4, [#allocation3]  }
 0x2a7   :  { %1729 = dma.done.wait [#allocation3], 128  }
 0x2a8   :  { %1730 = vsyncadd [#allocation3], 4294967168 }
 0x2a9   :  { %1336 = vsyncpa [#allocation3], 1 }

</bundles_post_ra>
